<compile_context>
chip_gen: v5e
topology: v5e:2x2
jax: 0.10.0
libtpu: 0.0.40
codegen_flags: <defaults>
</compile_context>

<pallas_src>
import functools

import jax
import jax.numpy as jnp
from jax import lax
from jax.experimental import pallas as pl
from jax.experimental.pallas import tpu as pltpu


def _cam_kernel(gamma_ref, x_ref, o_ref, e_ref, attn_ref, *,
                gram_dtype, apply_dtype, approx_reciprocal, squeezed):
    # Grid: (batch-block, pass, n-tile).
    p = pl.program_id(1)          # 0 = accumulate Gram / build attention, 1 = apply
    t = pl.program_id(2)          # N-tile index
    nt = pl.num_programs(2)

    @pl.when(p == 0)
    def _accumulate():
        @pl.when(t == 0)
        def _init():
            e_ref[...] = jnp.zeros_like(e_ref)
            # Defensive: the output window is parked on tile 0 for all of pass 0;
            # make sure an early writeback can never flush uninitialized data.
            o_ref[...] = jnp.zeros_like(o_ref)

        xg = x_ref[...].astype(gram_dtype)
        if squeezed:
            # (C, TN) x (C, TN), contracting the lane (N) axis of both -> (C, C).
            e_ref[...] += lax.dot_general(
                xg, xg, dimension_numbers=(((1,), (1,)), ((), ())),
                preferred_element_type=jnp.float32)
        else:
            e_ref[...] += jnp.einsum(
                "bcn,bdn->bcd", xg, xg, preferred_element_type=jnp.float32)

        @pl.when(t == nt - 1)
        def _finalize_attention():
            e = e_ref[...]
            # softmax(rowmax(E) - E) == exp(rowmin(E) - E) / sum(...)
            e_min = jnp.min(e, axis=-1, keepdims=True)
            pexp = jnp.exp(e_min - e)
            denom = jnp.sum(pexp, axis=-1, keepdims=True)
            attn = pexp * pl.reciprocal(denom, approx=approx_reciprocal)
            # Fold gamma into the attention and cache it once in the apply
            # dtype: pass 1's epilogue is then just `out + residual`.
            attn_ref[...] = (gamma_ref[0] * attn).astype(attn_ref.dtype)

    @pl.when(p == 1)
    def _apply():
        x_orig = x_ref[...]
        xm = x_orig.astype(apply_dtype)
        attn = attn_ref[...]
        if squeezed:
            out = jnp.dot(attn, xm, preferred_element_type=jnp.float32)
        else:
            out = jnp.einsum("bcd,bdn->bcn", attn, xm,
                             preferred_element_type=jnp.float32)
        o_ref[...] = (out + x_orig.astype(jnp.float32)).astype(o_ref.dtype)


def _divisors_desc(n, cap):
    return [d for d in range(min(n, cap), 0, -1) if n % d == 0]


def _vmem_capacity_bytes():
    """Per-TensorCore VMEM capacity (v5e/v6e: 128 MiB, v7x: 64 MiB)."""
    try:
        cap = getattr(pltpu.get_tpu_info(), "vmem_capacity_bytes", None)
        if cap:
            return int(cap)
    except Exception:
        pass
    return 64 << 20  # conservative fallback: smallest per-TC VMEM of the three gens


def _block_bytes(C, tn, bt, in_itemsize, gram_itemsize, apply_itemsize):
    """Conservative per-step VMEM footprint for one (bt, tn) tiling choice:
    double-buffered in/out blocks, both (C, C) scratches and the in-kernel
    temporaries (pass-1 f32 `out`, operand cast copy, store-cast copy)."""
    blk = bt * C * tn
    io = 2 * 2 * blk * in_itemsize                    # in + out, double-buffered
    scratches = bt * C * C * (4 + apply_itemsize)     # energy (f32) + attn cache
    temps = blk * (4 + max(gram_itemsize, apply_itemsize) + 4)
    return io + scratches + temps


def _auto_tiles(B, C, N_pad, in_itemsize, gram_itemsize, apply_itemsize, budget):
    """Pick (tile_n, batch_block).  Priority 1: full-N residency (nt == 1) so x
    is read from HBM exactly once.  Priority 2: biggest streaming tile that fits."""
    units = N_pad // 128
    if C >= 128:
        bt_candidates = [1]
    else:
        bt_candidates = _divisors_desc(B, max(1, min(B, 8, 128 // max(C, 1))))
        if 1 not in bt_candidates:
            bt_candidates.append(1)

    def need(tn, bt):
        return _block_bytes(C, tn, bt, in_itemsize, gram_itemsize, apply_itemsize)

    # 1) Full-N residency: input block index is identical in both passes.
    for bt in bt_candidates:
        if need(N_pad, bt) <= budget:
            return N_pad, bt

    # 2) Streaming fallback (x read twice), largest lane-dense tile first.
    # TODO(synk): on v7x, when the f32-resident block does not fit 64 MiB, a
    # (Bt, C, N_pad) bf16 VMEM x-cache filled during pass 0 would recover the
    # single-HBM-read property (at bf16 residual precision).
    for bt in bt_candidates:
        for tn_u in _divisors_desc(units, units):
            if need(tn_u * 128, bt) <= budget:
                return tn_u * 128, bt
    return 128, 1


def cam_module(x, gamma, *, gram_dtype=jnp.float32, apply_dtype=jnp.bfloat16,
               approx_reciprocal=True, tile_n=None, batch_block=None):
    """x: (B, C, H, W), gamma: (1,) -> (B, C, H, W); matches CAM_Module.forward.

    gram_dtype : MXU operand dtype for the energy (Gram) matmul.  f32 default,
        because energy entries are O(N) and feed the softmax exponent directly.
    apply_dtype: MXU operand dtype for the attention-apply matmul (bf16 fast
        path; attention rows sum to 1, so the output error stays small).
    """
    B, C, H, W = x.shape
    N = H * W
    # Lane-dense layout: pad N up to a multiple of 128 (zero columns do not
    # change the Gram matrix; padded output columns are sliced off below).
    N_pad = ((N + 127) // 128) * 128
    x_flat = x.reshape(B, C, N)
    if N_pad != N:
        x_flat = jnp.pad(x_flat, ((0, 0), (0, 0), (0, N_pad - N)))

    gram_isz = jnp.dtype(gram_dtype).itemsize
    apply_isz = jnp.dtype(apply_dtype).itemsize

    # Generation-aware VMEM budgeting.
    cap = _vmem_capacity_bytes()
    budget = int(cap * 0.70)          # ~90 MiB on v5e/v6e, ~45 MiB on v7x

    auto_tn, auto_bt = _auto_tiles(B, C, N_pad, x.dtype.itemsize,
                                   gram_isz, apply_isz, budget)
    tile_n = auto_tn if tile_n is None else tile_n
    batch_block = auto_bt if batch_block is None else batch_block
    assert N_pad % tile_n == 0, (N_pad, tile_n)
    assert B % batch_block == 0, (B, batch_block)
    n_tiles = N_pad // tile_n
    grid_b = B // batch_block

    vmem_est = _block_bytes(C, tile_n, batch_block, x.dtype.itemsize,
                            gram_isz, apply_isz) + (4 << 20)
    vmem_limit_bytes = int(min(max(vmem_est, 32 << 20), int(cap * 0.75)))

    squeezed = batch_block == 1
    kernel = functools.partial(
        _cam_kernel, gram_dtype=gram_dtype, apply_dtype=apply_dtype,
        approx_reciprocal=approx_reciprocal, squeezed=squeezed)

    if squeezed:
        # Kernel sees 2-D (C, TN) refs and plain 2-D MXU dots.
        blk = (None, C, tile_n)
        scratch_shapes = [pltpu.VMEM((C, C), jnp.float32),
                          pltpu.VMEM((C, C), apply_dtype)]
    else:
        blk = (batch_block, C, tile_n)
        scratch_shapes = [pltpu.VMEM((batch_block, C, C), jnp.float32),
                          pltpu.VMEM((batch_block, C, C), apply_dtype)]

    out_flat = pl.pallas_call(
        kernel,
        out_shape=jax.ShapeDtypeStruct((B, C, N_pad), x.dtype),
        grid_spec=pltpu.PrefetchScalarGridSpec(
            num_scalar_prefetch=0,
            grid=(grid_b, 2, n_tiles),
            in_specs=[
                pl.BlockSpec(memory_space=pltpu.SMEM),                 # gamma
                # With n_tiles == 1 this index map is (b, 0, 0) in BOTH passes,
                # so x stays VMEM-resident and is DMA'd from HBM exactly once.
                pl.BlockSpec(blk, lambda b, p, t: (b, 0, t)),
            ],
            # Pass 0 parks the output window on tile 0 (zero-initialized there);
            # pass 1 writes one lane-dense tile per step.
            out_specs=pl.BlockSpec(blk, lambda b, p, t: (b, 0, p * t)),
            scratch_shapes=scratch_shapes,
        ),
        compiler_params=pltpu.CompilerParams(
            # TODO(synk): on v7x (2 TCs) a B == 1 layer only uses one core; a
            # C-row-block "parallel" grid axis (or a two-call split) would
            # engage both TensorCores.
            dimension_semantics=("parallel", "arbitrary", "arbitrary"),
            vmem_limit_bytes=vmem_limit_bytes,
        ),
    )(gamma, x_flat)

    return out_flat[:, :, :N].reshape(B, C, H, W)


def cam_module_ref(x, gamma, gram_dtype=jnp.float32, apply_dtype=jnp.float32):
    """Pure-JAX reference mirroring the PyTorch forward (optionally with the
    same matmul-operand casting as the fast kernel path)."""
    B, C, H, W = x.shape
    xf = x.reshape(B, C, H * W).astype(jnp.float32)
    xg = xf.astype(gram_dtype)
    energy = jnp.einsum("bcn,bdn->bcd", xg, xg, preferred_element_type=jnp.float32)
    energy_new = jnp.max(energy, axis=-1, keepdims=True) - energy
    attn = jax.nn.softmax(energy_new, axis=-1)
    out = jnp.einsum("bcd,bdn->bcn", attn.astype(apply_dtype),
                     xf.astype(apply_dtype), preferred_element_type=jnp.float32)
    out = out.reshape(B, C, H, W)
    return gamma[0] * out + x.astype(jnp.float32)


if __name__ == "__main__":
    key = jax.random.PRNGKey(0)
    k1, k2, k3 = jax.random.split(key, 3)

    B, C, H, W = 2, 4, 16, 16
    x = jax.random.normal(k1, (B, C, H, W), dtype=jnp.float32)
    # nn.Parameter(torch.zeros(1)) initializes gamma to 0; use a nonzero value
    # so the attention path (not just the residual) is exercised.
    gamma = jnp.array([0.5], dtype=jnp.float32)

    # 1) Strict path: f32 everywhere, exact reciprocal, forced small tiles so
    #    the streaming (nt > 1) + squeezed (Bt == 1) code path is exercised.
    out_strict = jax.block_until_ready(
        cam_module(x, gamma, gram_dtype=jnp.float32, apply_dtype=jnp.float32,
                   approx_reciprocal=False, tile_n=128, batch_block=1))
    ref_f32 = cam_module_ref(x, gamma)
    assert out_strict.shape == (B, C, H, W)
    assert jnp.allclose(out_strict, ref_f32, atol=2e-3, rtol=2e-3)

    # 2) Fast default path: f32 Gram + bf16 apply matmul, approx reciprocal,
    #    auto tiles (nt == 1, batch-packed, x read from HBM exactly once).
    out_fast = jax.block_until_ready(cam_module(x, gamma))
    ref_fast = cam_module_ref(x, gamma, apply_dtype=jnp.bfloat16)
    assert jnp.allclose(out_fast, ref_fast, atol=2e-2, rtol=2e-2)
    assert jnp.allclose(out_fast, ref_f32, atol=5e-2, rtol=5e-2)

    # 3) Non-128-multiple spatial size: exercises the N-padding + slice path
    #    (auto tiles, f32 apply, exact reciprocal -> compares tightly to f32 ref).
    H3 = W3 = 12
    x3 = jax.random.normal(k2, (B, C, H3, W3), dtype=jnp.float32)
    out_pad = jax.block_until_ready(
        cam_module(x3, gamma, apply_dtype=jnp.float32, approx_reciprocal=False))
    ref_pad = cam_module_ref(x3, gamma)
    assert out_pad.shape == (B, C, H3, W3)
    assert jnp.allclose(out_pad, ref_pad, atol=2e-3, rtol=2e-3)

    # 4) C >= 128: squeezed (Bt == 1) resident-x path with 2-D MXU dots.
    x4 = jax.random.normal(k3, (1, 128, 8, 8), dtype=jnp.float32)
    out_big = jax.block_until_ready(cam_module(x4, gamma))
    ref_big = cam_module_ref(x4, gamma, apply_dtype=jnp.bfloat16)
    assert out_big.shape == (1, 128, 8, 8)
    assert jnp.allclose(out_big, ref_big, atol=2e-2, rtol=2e-2)

    print("KERNEL_OK")
</pallas_src>

<mosaic_0001>
module attributes {stable_mosaic.version = 11 : i64} {
  func.func @_cam_kernel(%arg0: i32, %arg1: i32, %arg2: i32, %arg3: memref<1xf32, #tpu.memory_space<smem>>, %arg4: memref<1x4x128xf32, #tpu.memory_space<vmem>>, %arg5: memref<1x4x128xf32, #tpu.memory_space<vmem>>, %arg6: memref<4x4xf32, #tpu.memory_space<vmem>>, %arg7: memref<4x4xf32, #tpu.memory_space<vmem>>) attributes {dimension_semantics = [#tpu.dimension_semantics<parallel>, #tpu.dimension_semantics<arbitrary>, #tpu.dimension_semantics<arbitrary>], iteration_bounds = array<i64: 2, 2, 2>, scalar_prefetch = 0 : i64, scratch_operands = 2 : i64, tpu.core_type = #tpu.core_type<tc>, window_params = [{transform_indices = @transform_0, window_bounds = array<i64: 1>}, {transform_indices = @transform_1, window_bounds = array<i64: 1, 4, 128>}, {transform_indices = @transform_2, window_bounds = array<i64: 1, 4, 128>}]} {
    %c0_i32 = arith.constant 0 : i32
    %0 = arith.cmpi eq, %arg1, %c0_i32 : i32
    %1 = arith.extui %0 : i1 to i32
    %c0_i32_0 = arith.constant 0 : i32
    %2 = arith.cmpi ne, %1, %c0_i32_0 : i32
    scf.if %2 {
      %c0_i32_2 = arith.constant 0 : i32
      %6 = arith.cmpi eq, %arg2, %c0_i32_2 : i32
      %7 = arith.extui %6 : i1 to i32
      %c0_i32_3 = arith.constant 0 : i32
      %8 = arith.cmpi ne, %7, %c0_i32_3 : i32
      scf.if %8 {
        %cst_12 = arith.constant 0.000000e+00 : f32
        %18 = vector.broadcast %cst_12 : f32 to vector<4x4xf32>
        %c0_13 = arith.constant 0 : index
        %c0_14 = arith.constant 0 : index
        %19 = vector.load %arg6[%c0_13, %c0_14] : memref<4x4xf32, #tpu.memory_space<vmem>>, vector<4x4xf32>
        tpu.vector_store %arg6[%c0_13, %c0_14], %18 {strides = array<i32>} : memref<4x4xf32, #tpu.memory_space<vmem>>, vector<4x4xf32>,
        %cst_15 = arith.constant 0.000000e+00 : f32
        %20 = vector.broadcast %cst_15 : f32 to vector<4x128xf32>
        %c0_16 = arith.constant 0 : index
        %c0_17 = arith.constant 0 : index
        %c0_18 = arith.constant 0 : index
        %21 = vector.load %arg5[%c0_16, %c0_17, %c0_18] : memref<1x4x128xf32, #tpu.memory_space<vmem>>, vector<1x4x128xf32>
        %22 = vector.shape_cast %21 : vector<1x4x128xf32> to vector<4x128xf32>
        %23 = vector.shape_cast %20 : vector<4x128xf32> to vector<1x4x128xf32>
        tpu.vector_store %arg5[%c0_16, %c0_17, %c0_18], %23 {strides = array<i32>} : memref<1x4x128xf32, #tpu.memory_space<vmem>>, vector<1x4x128xf32>,
      } else {
      }
      %c0 = arith.constant 0 : index
      %c0_4 = arith.constant 0 : index
      %c0_5 = arith.constant 0 : index
      %9 = vector.load %arg4[%c0, %c0_4, %c0_5] : memref<1x4x128xf32, #tpu.memory_space<vmem>>, vector<1x4x128xf32>
      %10 = vector.shape_cast %9 : vector<1x4x128xf32> to vector<4x128xf32>
      %c0_6 = arith.constant 0 : index
      %c0_7 = arith.constant 0 : index
      %11 = vector.load %arg6[%c0_6, %c0_7] : memref<4x4xf32, #tpu.memory_space<vmem>>, vector<4x4xf32>
      %cst = arith.constant dense<0.000000e+00> : vector<4x4xf32>
      %12 = tpu.matmul %10, %10, %cst {dimension_numbers = #tpu.dot_dimension_numbers<[1], [1], [0], [0], [0, 0, 1, 0], [], []>} : vector<4x128xf32>, vector<4x128xf32>, vector<4x4xf32> -> vector<4x4xf32>
      %13 = arith.addf %11, %12 : vector<4x4xf32>
      %c0_8 = arith.constant 0 : index
      %c0_9 = arith.constant 0 : index
      %14 = vector.load %arg6[%c0_8, %c0_9] : memref<4x4xf32, #tpu.memory_space<vmem>>, vector<4x4xf32>
      tpu.vector_store %arg6[%c0_8, %c0_9], %13 {strides = array<i32>} : memref<4x4xf32, #tpu.memory_space<vmem>>, vector<4x4xf32>,
      %c1_i32_10 = arith.constant 1 : i32
      %15 = arith.cmpi eq, %arg2, %c1_i32_10 : i32
      %16 = arith.extui %15 : i1 to i32
      %c0_i32_11 = arith.constant 0 : i32
      %17 = arith.cmpi ne, %16, %c0_i32_11 : i32
      scf.if %17 {
        %c0_12 = arith.constant 0 : index
        %c0_13 = arith.constant 0 : index
        %18 = vector.load %arg6[%c0_12, %c0_13] : memref<4x4xf32, #tpu.memory_space<vmem>>, vector<4x4xf32>
        %cst_14 = arith.constant dense<0x7F800000> : vector<4xf32>
        %19 = vector.multi_reduction <minimumf>, %18, %cst_14 [1] : vector<4x4xf32> to vector<4xf32>
        %20 = vector.shape_cast %19 : vector<4xf32> to vector<4x1xf32>
        %21 = vector.broadcast %20 : vector<4x1xf32> to vector<4x4xf32>
        %22 = arith.subf %21, %18 : vector<4x4xf32>
        %23 = math.exp %22 : vector<4x4xf32>
        %cst_15 = arith.constant dense<0.000000e+00> : vector<4xf32>
        %24 = vector.multi_reduction <add>, %23, %cst_15 [1] : vector<4x4xf32> to vector<4xf32>
        %25 = vector.shape_cast %24 : vector<4xf32> to vector<4x1xf32>
        %26 = tpu.reciprocal %25 : vector<4x1xf32> -> vector<4x1xf32>
        %27 = vector.broadcast %26 : vector<4x1xf32> to vector<4x4xf32>
        %28 = arith.mulf %23, %27 : vector<4x4xf32>
        %c0_16 = arith.constant 0 : index
        %29 = memref.load %arg3[%c0_16] : memref<1xf32, #tpu.memory_space<smem>>
        %30 = vector.broadcast %29 : f32 to vector<4x4xf32>
        %31 = arith.mulf %30, %28 : vector<4x4xf32>
        %c0_17 = arith.constant 0 : index
        %c0_18 = arith.constant 0 : index
        %32 = vector.load %arg7[%c0_17, %c0_18] : memref<4x4xf32, #tpu.memory_space<vmem>>, vector<4x4xf32>
        tpu.vector_store %arg7[%c0_17, %c0_18], %31 {strides = array<i32>} : memref<4x4xf32, #tpu.memory_space<vmem>>, vector<4x4xf32>,
      } else {
      }
    } else {
    }
    %c1_i32 = arith.constant 1 : i32
    %3 = arith.cmpi eq, %arg1, %c1_i32 : i32
    %4 = arith.extui %3 : i1 to i32
    %c0_i32_1 = arith.constant 0 : i32
    %5 = arith.cmpi ne, %4, %c0_i32_1 : i32
    scf.if %5 {
      %c0 = arith.constant 0 : index
      %c0_2 = arith.constant 0 : index
      %c0_3 = arith.constant 0 : index
      %6 = vector.load %arg4[%c0, %c0_2, %c0_3] : memref<1x4x128xf32, #tpu.memory_space<vmem>>, vector<1x4x128xf32>
      %7 = vector.shape_cast %6 : vector<1x4x128xf32> to vector<4x128xf32>
      %c0_4 = arith.constant 0 : index
      %c0_5 = arith.constant 0 : index
      %8 = vector.load %arg7[%c0_4, %c0_5] : memref<4x4xf32, #tpu.memory_space<vmem>>, vector<4x4xf32>
      %cst = arith.constant dense<0.000000e+00> : vector<4x128xf32>
      %9 = tpu.matmul %8, %7, %cst {dimension_numbers = #tpu.dot_dimension_numbers<[1], [0], [0], [1], [0, 0, 1, 1], [], []>} : vector<4x4xf32>, vector<4x128xf32>, vector<4x128xf32> -> vector<4x128xf32>
      %10 = arith.addf %9, %7 : vector<4x128xf32>
      %c0_6 = arith.constant 0 : index
      %c0_7 = arith.constant 0 : index
      %c0_8 = arith.constant 0 : index
      %11 = vector.load %arg5[%c0_6, %c0_7, %c0_8] : memref<1x4x128xf32, #tpu.memory_space<vmem>>, vector<1x4x128xf32>
      %12 = vector.shape_cast %11 : vector<1x4x128xf32> to vector<4x128xf32>
      %13 = vector.shape_cast %10 : vector<4x128xf32> to vector<1x4x128xf32>
      tpu.vector_store %arg5[%c0_6, %c0_7, %c0_8], %13 {strides = array<i32>} : memref<1x4x128xf32, #tpu.memory_space<vmem>>, vector<1x4x128xf32>,
    } else {
    }
    return
  }
  func.func @transform_0(%arg0: i32, %arg1: i32, %arg2: i32) -> i32 {
    %c0_i32 = arith.constant 0 : i32
    %c0_i32_0 = arith.constant 0 : i32
    return %c0_i32 : i32
  }
  func.func @transform_1(%arg0: i32, %arg1: i32, %arg2: i32) -> (i32, i32, i32) {
    %c0_i32 = arith.constant 0 : i32
    %c0_i32_0 = arith.constant 0 : i32
    return %arg0, %c0_i32, %arg2 : i32, i32, i32
  }
  func.func @transform_2(%arg0: i32, %arg1: i32, %arg2: i32) -> (i32, i32, i32) {
    %0 = arith.muli %arg1, %arg2 : i32
    %c0_i32 = arith.constant 0 : i32
    %c0_i32_0 = arith.constant 0 : i32
    return %arg0, %c0_i32, %0 : i32, i32, i32
  }
}

</mosaic_0001>

<bundles_post_ra>
// kernel: tpu_custom_call.1
= control target key start
LH: loop header
LB: loop body
LE: loop exit
PB: predicated region body
PF: predicated region fallthrough
CT: control target
= control target key end

     0   :  { %s963_s0 = inlined_call_operand.<no memory space> [shape: f32[1], index: 0, kind: input, shape index: {}]   ;;  %s964_s1 = inlined_call_operand.hbm [shape: f32[2,4,256], index: 1, kind: input, shape index: {}]   ;;  %s965_s2 = inlined_call_operand.hbm [shape: f32[2,4,256], index: 2, kind: output, shape index: {}]  }
   0x1   :  { %7 = sst [smem:[#allocation4]] %s963_s0 }
   0x2   :  { %8 = vsyncpa [#allocation6], 0 }
   0x3   :  { %10 = vsyncpa [#allocation6 + $0x1], 0 }
   0x4   :  { %11 = vsyncpa [#allocation7], 0 }
   0x5   :  { %13 = vsyncpa [#allocation7 + $0x1], 0  ;;  %s737_s11 = smov 0   ;;  %s739_s12 = smov 0  }
   0x6   :  { %s741_s13 = smov 0   ;;  %s743_s14 = smov 0  }
   0x7   :  { %s745_s15 = smov 0   ;;  %s747_s16 = smov 0  }
   0x8   :  { %s749_s17 = smov 0   ;;  %s751_s18 = smov 0  }
   0x9   :  { %s753_s0 = smov 0   ;;  %s755_s19 = smov 0  }
   0xa   :  { %s757_s20 = smov 0   ;;  %s759_s21 = smov 0  }
   0xb   :  { %s761_s22 = smov 0  }
   0xc LB: > { %970 = sst [smem:[#allocation11_spill]] %s708_s20  ;;  %s404_s23 = sadd.s32 4294967295, %s716_s22   ;;  %s716_s22 = sphi %s761_s22, %s19_s22   ;;  %s712_s21 = sphi %s759_s21, %s992_s21   ;;  %s708_s20 = sphi %s757_s20, %s981_s20   ;;  %s704_s19 = sphi %s755_s19, %s991_s19   ;;  %s700_s0 = sphi %s753_s0, %s990_s0   ;;  %s696_s18 = sphi %s751_s18, %s979_s18   ;;  %s692_s17 = sphi %s749_s17, %s989_s17   ;;  %s688_s16 = sphi %s747_s16, %s988_s16   ;;  %s684_s15 = sphi %s745_s15, %s987_s15   ;;  %s680_s14 = sphi %s743_s14, %s986_s14   ;;  %s676_s13 = sphi %s741_s13, %s985_s13   ;;  %s672_s12 = sphi %s739_s12, %s984_s12   ;;  %s668_s11 = sphi %s737_s11, %s983_s11  }
   0xd   : > { %s405_s24 = sadd.s32 4294967294, %s716_s22   ;;  %s31_s25 = sadd.s32 1, %s704_s19 }
   0xe   : > { %s34_s26 = sadd.s32 1, %s708_s20  ;;  %p32_p0 = scmp.ge.s32.totalorder %s31_s25, 2 }
   0xf   : > { %s38_s27 = sadd.s32 1, %s712_s21  ;;  %s68_s28 = sadd.s32 1, %s688_s16 }
  0x10   : > { %p75_p1 = scmp.ne.s32.totalorder %s688_s16, %s684_s15  ;;  %s994_s25 = smov (%p32_p0, %s31_s25), 0 }
  0x11   : > { %971 = sst [smem:[#allocation12_spill]] %s994_s25  ;;  %s996_s26 = smov (!%p32_p0, %s34_s26), %s708_s20 }
  0x12   : > { %s64_s29 = ssub.s32 %s704_s19, %s994_s25  ;;  %p76_p2 = scmp.eq.s32.totalorder %s716_s22, 0 }
  0x13   : > { %p36_p3 = scmp.ge.s32.totalorder %s996_s26, 2  ;;  %p81_p4 = scmp.ne.s32.totalorder %s684_s15, %s680_s14 }
  0x14   : > { %p815_p5 = por %p76_p2, %p75_p1  ;;  %p82_p6 = scmp.eq.s32.totalorder %s404_s23, 0 }
  0x15   : > { %s998_s26 = smov (%p36_p3, %s996_s26), 0  ;;  %s1000_s27 = smov (!%p36_p3, %s38_s27), %s712_s21 }
  0x16   : > { %973 = sst [smem:[#allocation13_spill]] %s998_s26  ;;  %p822_p7 = por %p82_p6, %p81_p4 }
  0x17   : > { %s91_s4 = smul.u32 %s704_s19, %s708_s20  ;;  %p40_p8 = scmp.ge.s32.totalorder %s1000_s27, 2 }
  0x18   : > { %s92_s5 = smul.u32 %s998_s26, %s994_s25  ;;  %s98_s6 = sadd.s32 1, %s676_s13 }
  0x19   : > { %p108_p9 = scmp.ne.s32.totalorder %s676_s13, %s672_s12  ;;  %s1002_s27 = smov (%p40_p8, %s1000_s27), 0 }
  0x1a   : > { %975 = sst [smem:[#allocation14_spill]] %s1002_s27  ;;  %s94_s7 = ssub.s32 %s91_s4, %s92_s5 }
  0x1b   : > { %p109_p10 = scmp.eq.s32.totalorder %s404_s23, 7  ;;  %s63_s8 = ssub.s32 %s712_s21, %s1002_s27 }
  0x1c   : > { %p114_p11 = scmp.ne.s32.totalorder %s672_s12, %s668_s11  ;;  %s65_s9 = sor.u32 %s64_s29, %s63_s8 }
  0x1d   : > { %s95_s10 = sor.u32 %s94_s7, %s63_s8  ;;  %p66_p12 = scmp.eq.s32.totalorder %s65_s9, 0 }
  0x1e   : > { %p96_p13 = scmp.eq.s32.totalorder %s95_s10, 0  ;;  %p839_p0 = por %p109_p10, %p108_p9 }
  0x1f   : > { %p115_p1 = scmp.eq.s32.totalorder %s405_s24, 7  ;;  %p437_p3 = scmp.lt.s32.totalorder %s716_s22, 8 }
  0x20   : > { %s848_s26 = scalar_select %p66_p12, %s688_s16, %s68_s28  }
  0x21   : > { %s851_s4 = scalar_select %p96_p13, %s676_s13, %s98_s6  }
  0x22   : > { %p853_p2 = por %p115_p1, %p114_p11  ;;  %s138_s29 = sand.u32 1, %s688_s16  }
  0x23   : > { %s408_s5 = sshll.u32 %s138_s29, 2  ;;  %s409_s7 = sshll.u32 %s712_s21, 1 }
  0x24   : > { %s146_s8 = sadd.s32 %s704_s19, %s409_s7  ;;  %s142_s9 = scalar_lea.vmem [#allocation5], %s408_s5 }
  0x25   : > { %s152_s10 = sshll.u32 %s142_s9, 4  ;;  %s410_s27 = sshll.u32 %s146_s8, 2  ;;  %s153_s10 = int_to_ptr.vmem [resolvable:$true] %s152_s10 }
  0x26   : > { %s148_s28 = scalar_lea.hbm %s964_s1, %s410_s27  ;;  %p430_p4 = pnand %p437_p3, %p815_p5 }
  0x27   : > { %s150_s6 = sshll.u32 %s148_s28, 4  ;;  %p411_p6 = scmp.ge.s32.totalorder %s716_s22, 1  ;;  %s151_s6 = int_to_ptr.hbm [resolvable:$true] %s150_s6 }
  0x28   : > { %s139_s20 = scalar_lea.sflag [#allocation6], %s138_s29  ;;  %p157_p8 = scmp.lt.s32.totalorder %s716_s22, 9 }
  0x29   : > { %432 = dma.hbm_to_vmem [thread:$0]  (!%p430_p4), %s151_s6, 64, %s153_s10, %s139_s20  }
  0x2a   : > { %p158_p9 = pnand %p411_p6, %p157_p8 }
  0x2b   : > { %s163_s5 = sand.u32 (!%p158_p9), 1, %s684_s15  }
  0x2c   : > { %161 = sbr.rel (%p158_p9) target bundleno = 628 (0x274), region = 28  ;;  %s869_s7 = sshll.u32 (!%p158_p9), %s163_s5, 2 }
  0x2d   : > { %s164_s8 = scalar_lea.sflag (!%p158_p9), [#allocation6], %s163_s5  ;;  %s167_s9 = scalar_lea.vmem (!%p158_p9), [#allocation5], %s869_s7 }
  0x31   : > { %659 = dma.done.wait (%p822_p7), %s164_s8, 64  }
  0x32   : > { %661 = vsyncadd (%p822_p7), %s164_s8, 4294967232  ;;  %s186_s25 = sand.u32 1, %s672_s12   ;;  %p414_p5 = scmp.ne.s32.totalorder %s696_s18, 0 }
  0x33   : > { %s413_s20 = sshll.u32 %s186_s25, 2  ;;  %p415_p10 = scmp.ne.s32.totalorder (!%p414_p5), %s692_s17, 0 }
  0x34   : > { %s879_s27 = scalar_lea.vmem [#allocation8], %s413_s20  ;;  %193 = sbr.rel (%p414_p5) target bundleno = 472 (0x1d8), region = 36 }
  0x39   : > { %197 = sbr.rel (%p415_p10) target bundleno = 65 (0x41), region = 40 }
  0x3e   : > { %vm198_vm0 = vcmask 27648   ;;  %v718_v0 = vmov 0.0  }
  0x3f   : > { %199 = vst.msk [vmem:[#allocation2] sm:$0xf] %vm198_vm0, %v718_v0 }
  0x40   : > { %200 = vst [vmem:[%s879_s27] sm:$0xf] %v718_v0 }
  0x41 PF: > { %v201_v1 = vld [vmem:[%s167_s9] sm:$0xf]  ;;  %vm224_vm1 = vcmask 27648   ;;  %p416_p7 = scmp.ne.s32.totalorder %s692_s17, 1 }
  0x42   : > { %218 = vmatpush.xpose.msra.mxu0 %v201_v1  ;;  %s255_s30 = sld [smem:[#allocation4]] (!%p416_p7) }
  0x45   : > { %219 = vmatmul.f32.vlgmr.msra.gmra.mxu0 %v201_v1 }
  0x46   : > { %v202_v2 = vld [vmem:[#allocation2] sm:$0xf] }
  0xc1   : > { %229 = sbr.rel (%p416_p7) target bundleno = 472 (0x1d8), region = 44 }
  0xc2   : > { %v220_v3 = vpop.f32.mrf.mxu0 }
  0xc3   : > { %v223_v4 = vadd.f32 %v220_v3, %v202_v2 }
  0xc5   : > { %225 = vst.msk [vmem:[#allocation2] sm:$0xf] %vm224_vm1, %v223_v4 }
  0xc6   : > { %v256_v22 = vstv %s255_s30 }
  0xcc   : > { %v230_v5 = vld [vmem:[#allocation2] sm:$0xf] }
  0xcd   : > { %v231_v6 = vsel %vm224_vm1, %v230_v5, inf }
  0xce   : > { %232 = vmin.xlane.f32.xlu0 %v231_v6 }
 0x141   : > { %v233_v7 = vpop.xlane.xlu0 %232 }
 0x142   : > { %v234_v8 = vsub.f32 %v233_v7, %v230_v5 }
 0x144   : > { %v235_v9 = vmul.f32 1.442695, %v234_v8 }
 0x146   : > { %544 = vpow2.f32 %v235_v9 }
 0x14c   : > { %v545_v10 = vpop.eup %544 }
 0x14d   : > { %v237_v11 = vsel %vm224_vm1, %v545_v10, 0.0 }
 0x14e   : > { %238 = vadd.xlane.f32.xlu0 %v237_v11 }
 0x1c1   : > { %v239_v12 = vpop.xlane.xlu0 %238 }
 0x1c2   : > { %546 = vrcp.f32 %v239_v12  ;;  %v251_v16 = vand.u32 2147483648, %v239_v12  ;;  %v249_v18 = vand.u32 2147483647, %v239_v12  ;;  %vm245_vm3 = vweird.f32 %v239_v12 }
 0x1c4   : > { %v252_v20 = vor.u32 1.1754944e-38, %v251_v16  ;;  %vm250_vm5 = vcmp.eq.f32.partialorder %v249_v18, 8.507059e+37 }
 0x1c8   : > { %v547_v13 = vpop.eup %546 }
 0x1c9   : > { %v241_v14 = vmul.f32 %v547_v13, %v239_v12  ;;  %vm246_vm2 = vweird.f32 %v547_v13 }
 0x1ca   : > { %vm247_vm4 = vmor %vm245_vm3, %vm246_vm2 }
 0x1cb   : > { %v242_v15 = vsub.f32 1.0, %v241_v14 }
 0x1cd   : > { %v243_v17 = vmul.f32 %v547_v13, %v242_v15 }
 0x1cf   : > { %v244_v19 = vadd.f32 %v547_v13, %v243_v17 }
 0x1d1   : > { %v248_v21 = vsel %vm247_vm4, %v547_v13, %v244_v19 }
 0x1d2   : > { %v253_v23 = vsel %vm250_vm5, %v252_v20, %v248_v21 }
 0x1d3   : > { %v254_v24 = vmul.f32 %v545_v10, %v253_v23 }
 0x1d5   : > { %v257_v25 = vmul.f32 %v256_v22, %v254_v24 }
 0x1d7   : > { %258 = vst.msk [vmem:[#allocation3] sm:$0xf] %vm224_vm1, %v257_v25 }
 0x1d8 PF: > { %p417_p11 = scmp.ne.s32.totalorder %s696_s18, 1 }
 0x1da   : > { %262 = sbr.rel (%p417_p11) target bundleno = 610 (0x262), region = 48 }
 0x1df   : > { %v263_v26 = vld [vmem:[%s167_s9] sm:$0xf]  ;;  %vm269_vm6 = vcmask 1043456   ;;  %v264_v27 = vld [vmem:[#allocation3] sm:$0xf]  ;;  %vm265_vm7 = vcmask 31744  }
 0x1e0   : > { %418 = vmatpush.msk.msra.mxu0 %vm269_vm6, %v263_v26 }
 0x1e1   : > { %419 = vmatmul.msk.f32.vlgmr.msra.gmra.mxu0 %vm265_vm7, %v264_v27 }
 0x25e   : > { %v290_v28 = vpop.f32.mrf.mxu0 }
 0x25f   : > { %v291_v29 = vadd.f32 %v290_v28, %v263_v26 }
 0x261   : > { %293 = vst [vmem:[%s879_s27] sm:$0xf] %v291_v29 }
 0x262 PF: > { %s302_s3 = smul.u32 %s692_s17, %s696_s18  ;;  %s421_s29 = sshll.u32 %s700_s0, 1 }
 0x263   : > { %s310_s10 = sshll.u32 %s879_s27, 4  ;;  %s295_s9 = scalar_lea.sflag [#allocation7], %s186_s25  ;;  %s311_s10 = int_to_ptr.vmem [resolvable:$true] %s310_s10 }
 0x264   : > { %s306_s24 = sadd.s32 %s421_s29, %s302_s3  ;;  %s598_s0 = scalar_lea.hbm %s965_s2, 16 }
 0x265   : > { %s422_s28 = sshll.u32 %s306_s24, 2 }
 0x266   : > { %s308_s7 = scalar_lea.hbm %s965_s2, %s422_s28 }
 0x267   : > { %s312_s8 = sshll.u32 %s308_s7, 4  ;;  %s313_s8 = int_to_ptr.hbm [resolvable:$true] %s312_s8 }
 0x268   : > { %s592_s20 = sshra.s32 %s313_s8, 4  ;;  %s593_s20 = int_to_ptr.hbm [resolvable:$true] %s592_s20 }
 0x269   : > { %s594_s30 = scalar_lea.hbm %s593_s20, 4  ;;  %p599_p3 = scmp.lt.s32.totalorder %s593_s20, %s965_s2 }
 0x26a   : > { %p595_p12 = scmp.ne.s32.totalorder %s593_s20, %s594_s30  ;;  %p600_p4 = scmp.lt.s32.totalorder %s598_s0, %s594_s30 }
 0x26c   : > { %p596_p13 = pnand %p595_p12, %p839_p0  ;;  %p601_p6 = por %p600_p4, %p599_p3 }
 0x26e   : > { %p597_p1 = pneg %p596_p13 }
 0x270   : > { %p602_p8 = pnand %p601_p6, %p597_p1 }
 0x272   : > { %605 = shalt.err (!%p602_p8)
}
 0x273   : > { %427 = dma.vmem_to_hbm [thread:$0]  (%p839_p0), %s311_s10, 64, %s313_s8, %s295_s9  }
 0x274 PF: > { %p438_p9 = scmp.ge.s32.totalorder %s716_s22, 2  ;;  %s324_s25 = sand.u32 1, %s668_s11  }
 0x275   : > { %s325_s29 = scalar_lea.sflag [#allocation7], %s324_s25 }
 0x276   : > { %p434_p5 = pnand %p438_p9, %p853_p2 }
 0x278   : > { %p435_p10 = pneg %p434_p5 }
 0x27a   : > { %663 = dma.done.wait (%p435_p10), %s325_s29, 64  }
 0x27b   : > { %665 = vsyncadd (%p435_p10), %s325_s29, 4294967232  ;;  %s19_s22 = sadd.s32 1, %s716_s22   ;;  %s979_s18 = sld [smem:[#allocation11_spill]] }
 0x27c   : > { %p919_p7 = scmp.ge.s32.totalorder %s19_s22, 10   ;;  %s980_s23 = sld [smem:[#allocation12_spill]] }
 0x27d   : > { %s981_s20 = sld [smem:[#allocation13_spill]]  ;;  %s983_s11 = smov %s672_s12 }
 0x27e   : > { %s982_s10 = sld [smem:[#allocation14_spill]]  ;;  %s984_s12 = smov %s676_s13 }
 0x27f   : > { %s985_s13 = smov %s851_s4  ;;  %s986_s14 = smov %s684_s15 }
 0x280   : > { %s987_s15 = smov %s688_s16  ;;  %s988_s16 = smov %s848_s26 }
 0x281   : > { %s989_s17 = smov %s704_s19  ;;  %s990_s0 = smov %s712_s21 }
 0x282   : > { %s991_s19 = smov %s980_s23  ;;  %18 = sbr.rel (!%p919_p7) target bundleno = 12 (0xc), region = 89 }
 0x284   : > { %s992_s21 = smov %s982_s10 }
 0x287   :  { %331 = vsyncpa [#allocation6], 1 }
 0x288   :  { %333 = vsyncpa [#allocation6 + $0x1], 1 }
 0x289   :  { %334 = vsyncpa [#allocation7], 1 }
 0x28a   :  { %336 = vsyncpa [#allocation7 + $0x1], 1 }

</bundles_post_ra>
